<compile_context>
chip_gen: v5e
topology: v5e:2x2
jax: 0.10.0
libtpu: 0.0.40
codegen_flags: <defaults>
</compile_context>

<pallas_src>
import jax
import jax.numpy as jnp
from jax.experimental import pallas as pl
from jax.experimental.pallas import tpu as pltpu


def _make_mlp_kernel(compute_dtype):
    """Builds the fused 13->128->256->64->1 MLP kernel.

    compute_dtype controls the bias-add/ReLU epilogue precision:
      * bf16 on v6e/v7x (bf16-capable VPU -> half the VALU work, no extra casts)
      * f32 on v5e and older (no bf16 VPU)
    The MXU matmuls always take bf16 operands with f32 accumulation.
    """

    def kernel(x_ref,
               w1_ref, b1_ref,
               w2_ref, b2_ref,
               w3_ref, b3_ref,
               w4_ref, b4_ref,
               o_ref):
        def layer(h, w_ref, b_ref):
            h = jnp.dot(h.astype(jnp.bfloat16), w_ref[...],
                        preferred_element_type=jnp.float32)
            h = h.astype(compute_dtype) + b_ref[...]
            return jnp.maximum(h, 0)

        h = layer(x_ref[...], w1_ref, b1_ref)   # (tile_b, 128)
        h = layer(h, w2_ref, b2_ref)            # (tile_b, 256)
        h = layer(h, w3_ref, b3_ref)            # (tile_b, 64)

        # Final 64 -> 1 layer, emitted lane-dense: contract the 64-dim of h
        # against the (1, 64) weight row (transposed-rhs dot, same pattern as
        # q @ k^T in flash attention) so the result is a (1, tile_b) row.
        y = jax.lax.dot_general(
            w4_ref[...], h.astype(jnp.bfloat16),
            dimension_numbers=(((1,), (1,)), ((), ())),
            preferred_element_type=jnp.float32)          # (1, tile_b)
        y = y + b4_ref[...]
        o_ref[...] = y[None].astype(o_ref.dtype)         # (1, 1, tile_b)

    return kernel


def _default_compute_dtype():
    """bf16 epilogue on bf16-capable VPUs (v6e/v7x); f32 on v5e and older."""
    try:
        kind = jax.devices()[0].device_kind.lower()
    except Exception:
        return jnp.float32
    if any(v in kind for v in ("v2", "v3", "v4", "v5")):
        return jnp.float32
    return jnp.bfloat16


def linear_regression_model(x, params, tile_b=2048, compute_dtype=None):
    """Fused forward pass of the 13->128->256->64->1 ReLU MLP.

    params: list of (W, b) with W shaped (in, out) (transpose of PyTorch's
    nn.Linear weight) and b shaped (1, out).  Returns y of shape (batch, 1).
    """
    if compute_dtype is None:
        compute_dtype = _default_compute_dtype()

    assert tile_b % 128 == 0, "tile_b must be a multiple of 128 (lane-dense output)"

    (w1, b1), (w2, b2), (w3, b3), (w4, b4) = params
    batch, in_features = x.shape

    # No whole-array padding of x: grid covers batch with cdiv; the partial last
    # tile uses Pallas edge-block handling (over-read rows are don't-care and the
    # corresponding output tail is sliced off below).
    num_tiles = pl.cdiv(batch, tile_b)

    # bf16 MXU operands; biases in the epilogue compute dtype; the final-layer
    # weight column is passed as a (1, 64) bf16 row.
    w1b = w1.astype(jnp.bfloat16)
    w2b = w2.astype(jnp.bfloat16)
    w3b = w3.astype(jnp.bfloat16)
    w4b = w4.reshape(1, -1).astype(jnp.bfloat16)
    b1c = b1.astype(compute_dtype)
    b2c = b2.astype(compute_dtype)
    b3c = b3.astype(compute_dtype)
    b4f = b4.astype(jnp.float32)

    const = lambda i: (0, 0)   # resident weight/bias blocks (fetched once)

    flops = 2 * batch * (13 * 128 + 128 * 256 + 256 * 64 + 64 * 1)
    weight_bytes = sum(int(a.size) * a.dtype.itemsize
                       for a in (w1b, b1c, w2b, b2c, w3b, b3c, w4b, b4f))
    bytes_accessed = int(batch * in_features * x.dtype.itemsize
                         + batch * 4 + weight_bytes)

    out = pl.pallas_call(
        _make_mlp_kernel(compute_dtype),
        out_shape=jax.ShapeDtypeStruct((num_tiles, 1, tile_b), jnp.float32),
        grid_spec=pltpu.PrefetchScalarGridSpec(
            num_scalar_prefetch=0,
            grid=(num_tiles,),
            in_specs=[
                pl.BlockSpec((tile_b, in_features), lambda i: (i, 0)),   # x tile
                pl.BlockSpec(w1b.shape, const),
                pl.BlockSpec(b1c.shape, const),
                pl.BlockSpec(w2b.shape, const),
                pl.BlockSpec(b2c.shape, const),
                pl.BlockSpec(w3b.shape, const),
                pl.BlockSpec(b3c.shape, const),
                pl.BlockSpec(w4b.shape, const),
                pl.BlockSpec(b4f.shape, const),
            ],
            out_specs=pl.BlockSpec((1, 1, tile_b), lambda i: (i, 0, 0)),
        ),
        compiler_params=pltpu.CompilerParams(
            dimension_semantics=("parallel",),      # both TCs on v7x; no-op elsewhere
            vmem_limit_bytes=32 * 1024 * 1024,      # explicit (v5e default is 16 MiB)
        ),
        cost_estimate=pl.CostEstimate(
            flops=flops, transcendentals=0, bytes_accessed=bytes_accessed),
    )(x, w1b, b1c, w2b, b2c, w3b, b3c, w4b, b4f)

    # (num_tiles, 1, tile_b) -> (batch, 1); only the tiny output tail is sliced.
    return out.reshape(num_tiles * tile_b, 1)[:batch]


def init_params(key):
    """Deterministic init matching nn.Linear shapes: 13->128->256->64->1."""
    dims = [(13, 128), (128, 256), (256, 64), (64, 1)]
    params = []
    for i, (fan_in, fan_out) in enumerate(dims):
        kw, kb, key = jax.random.split(jax.random.fold_in(key, i), 3)
        bound = 1.0 / jnp.sqrt(fan_in)
        # W stored as (in, out) = transpose of PyTorch's (out, in)
        w = jax.random.uniform(kw, (fan_in, fan_out), jnp.float32, -bound, bound)
        b = jax.random.uniform(kb, (1, fan_out), jnp.float32, -bound, bound)
        params.append((w, b))
    return params


def reference_forward(x, params, compute_dtype=jnp.float32):
    """Pure-JAX reference mirroring the kernel numerics (bf16 MXU, f32 accum,
    epilogue in compute_dtype)."""
    (w1, b1), (w2, b2), (w3, b3), (w4, b4) = params

    def layer(h, w, b):
        h = jnp.dot(h.astype(jnp.bfloat16), w.astype(jnp.bfloat16),
                    preferred_element_type=jnp.float32)
        h = h.astype(compute_dtype) + b.astype(compute_dtype)
        return jnp.maximum(h, 0)

    h = layer(x, w1, b1)
    h = layer(h, w2, b2)
    h = layer(h, w3, b3)
    y = jnp.dot(h.astype(jnp.bfloat16), w4.astype(jnp.bfloat16),
                preferred_element_type=jnp.float32) + b4
    return y


if __name__ == "__main__":
    key = jax.random.PRNGKey(0)
    kx, kp, kx2 = jax.random.split(key, 3)

    params = init_params(kp)
    compute_dtype = _default_compute_dtype()

    # Small case: single partial tile (8 rows < tile_b), exercises edge-block reads.
    batch = 8
    x = jax.random.normal(kx, (batch, 13), dtype=jnp.float32)
    out = jax.block_until_ready(
        linear_regression_model(x, params, tile_b=128, compute_dtype=compute_dtype))
    ref = reference_forward(x, params, compute_dtype)
    assert out.shape == (batch, 1), out.shape
    assert jnp.allclose(out, ref, atol=1e-2, rtol=1e-2), "mismatch vs reference (small)"

    # Multi-tile case with a non-multiple batch (2 full tiles + 1 partial tile).
    batch2 = 700
    x2 = jax.random.normal(kx2, (batch2, 13), dtype=jnp.float32)
    out2 = jax.block_until_ready(
        linear_regression_model(x2, params, tile_b=256, compute_dtype=compute_dtype))
    ref2 = reference_forward(x2, params, compute_dtype)
    assert out2.shape == (batch2, 1), out2.shape
    assert jnp.allclose(out2, ref2, atol=1e-2, rtol=1e-2), "mismatch vs reference (tiled)"

    print("KERNEL_OK")
</pallas_src>

<mosaic_0001>
module attributes {stable_mosaic.version = 11 : i64} {
  func.func @kernel(%arg0: i32, %arg1: memref<128x13xf32, #tpu.memory_space<vmem>>, %arg2: memref<13x128xbf16, #tpu.memory_space<vmem>>, %arg3: memref<1x128xbf16, #tpu.memory_space<vmem>>, %arg4: memref<128x256xbf16, #tpu.memory_space<vmem>>, %arg5: memref<1x256xbf16, #tpu.memory_space<vmem>>, %arg6: memref<256x64xbf16, #tpu.memory_space<vmem>>, %arg7: memref<1x64xbf16, #tpu.memory_space<vmem>>, %arg8: memref<1x64xbf16, #tpu.memory_space<vmem>>, %arg9: memref<1x1xf32, #tpu.memory_space<vmem>>, %arg10: memref<1x1x128xf32, #tpu.memory_space<vmem>>) attributes {dimension_semantics = [#tpu.dimension_semantics<parallel>], iteration_bounds = array<i64: 1>, scalar_prefetch = 0 : i64, scratch_operands = 0 : i64, tpu.core_type = #tpu.core_type<tc>, window_params = [{transform_indices = @transform_0, window_bounds = array<i64: 128, 13>}, {pipeline_mode = #tpu.pipeline_mode<synchronous>, transform_indices = @transform_1, window_bounds = array<i64: 13, 128>}, {pipeline_mode = #tpu.pipeline_mode<synchronous>, transform_indices = @transform_2, window_bounds = array<i64: 1, 128>}, {pipeline_mode = #tpu.pipeline_mode<synchronous>, transform_indices = @transform_3, window_bounds = array<i64: 128, 256>}, {pipeline_mode = #tpu.pipeline_mode<synchronous>, transform_indices = @transform_4, window_bounds = array<i64: 1, 256>}, {pipeline_mode = #tpu.pipeline_mode<synchronous>, transform_indices = @transform_5, window_bounds = array<i64: 256, 64>}, {pipeline_mode = #tpu.pipeline_mode<synchronous>, transform_indices = @transform_6, window_bounds = array<i64: 1, 64>}, {pipeline_mode = #tpu.pipeline_mode<synchronous>, transform_indices = @transform_7, window_bounds = array<i64: 1, 64>}, {pipeline_mode = #tpu.pipeline_mode<synchronous>, transform_indices = @transform_8, window_bounds = array<i64: 1, 1>}, {transform_indices = @transform_9, window_bounds = array<i64: 1, 1, 128>}]} {
    %c0 = arith.constant 0 : index
    %c0_0 = arith.constant 0 : index
    %0 = vector.load %arg1[%c0, %c0_0] : memref<128x13xf32, #tpu.memory_space<vmem>>, vector<128x13xf32>
    %1 = arith.truncf %0 : vector<128x13xf32> to vector<128x13xbf16>
    %c0_1 = arith.constant 0 : index
    %c0_2 = arith.constant 0 : index
    %2 = vector.load %arg2[%c0_1, %c0_2] : memref<13x128xbf16, #tpu.memory_space<vmem>>, vector<13x128xbf16>
    %cst = arith.constant dense<0.000000e+00> : vector<128x128xf32>
    %3 = tpu.matmul %1, %2, %cst {dimension_numbers = #tpu.dot_dimension_numbers<[1], [0], [0], [1], [0, 0, 1, 1], [], []>} : vector<128x13xbf16>, vector<13x128xbf16>, vector<128x128xf32> -> vector<128x128xf32>
    %4 = arith.truncf %3 : vector<128x128xf32> to vector<128x128xbf16>
    %c0_3 = arith.constant 0 : index
    %c0_4 = arith.constant 0 : index
    %5 = vector.load %arg3[%c0_3, %c0_4] : memref<1x128xbf16, #tpu.memory_space<vmem>>, vector<1x128xbf16>
    %6 = vector.broadcast %5 : vector<1x128xbf16> to vector<128x128xbf16>
    %7 = arith.addf %4, %6 : vector<128x128xbf16>
    %cst_5 = arith.constant 0.000000e+00 : bf16
    %8 = vector.broadcast %cst_5 : bf16 to vector<128x128xbf16>
    %9 = arith.maximumf %7, %8 : vector<128x128xbf16>
    %c0_6 = arith.constant 0 : index
    %c0_7 = arith.constant 0 : index
    %10 = vector.load %arg4[%c0_6, %c0_7] : memref<128x256xbf16, #tpu.memory_space<vmem>>, vector<128x256xbf16>
    %cst_8 = arith.constant dense<0.000000e+00> : vector<128x256xf32>
    %11 = tpu.matmul %9, %10, %cst_8 {dimension_numbers = #tpu.dot_dimension_numbers<[1], [0], [0], [1], [0, 0, 1, 1], [], []>} : vector<128x128xbf16>, vector<128x256xbf16>, vector<128x256xf32> -> vector<128x256xf32>
    %12 = arith.truncf %11 : vector<128x256xf32> to vector<128x256xbf16>
    %c0_9 = arith.constant 0 : index
    %c0_10 = arith.constant 0 : index
    %13 = vector.load %arg5[%c0_9, %c0_10] : memref<1x256xbf16, #tpu.memory_space<vmem>>, vector<1x256xbf16>
    %14 = vector.broadcast %13 : vector<1x256xbf16> to vector<128x256xbf16>
    %15 = arith.addf %12, %14 : vector<128x256xbf16>
    %cst_11 = arith.constant 0.000000e+00 : bf16
    %16 = vector.broadcast %cst_11 : bf16 to vector<128x256xbf16>
    %17 = arith.maximumf %15, %16 : vector<128x256xbf16>
    %c0_12 = arith.constant 0 : index
    %c0_13 = arith.constant 0 : index
    %18 = vector.load %arg6[%c0_12, %c0_13] : memref<256x64xbf16, #tpu.memory_space<vmem>>, vector<256x64xbf16>
    %cst_14 = arith.constant dense<0.000000e+00> : vector<128x64xf32>
    %19 = tpu.matmul %17, %18, %cst_14 {dimension_numbers = #tpu.dot_dimension_numbers<[1], [0], [0], [1], [0, 0, 1, 1], [], []>} : vector<128x256xbf16>, vector<256x64xbf16>, vector<128x64xf32> -> vector<128x64xf32>
    %20 = arith.truncf %19 : vector<128x64xf32> to vector<128x64xbf16>
    %c0_15 = arith.constant 0 : index
    %c0_16 = arith.constant 0 : index
    %21 = vector.load %arg7[%c0_15, %c0_16] : memref<1x64xbf16, #tpu.memory_space<vmem>>, vector<1x64xbf16>
    %22 = vector.broadcast %21 : vector<1x64xbf16> to vector<128x64xbf16>
    %23 = arith.addf %20, %22 : vector<128x64xbf16>
    %cst_17 = arith.constant 0.000000e+00 : bf16
    %24 = vector.broadcast %cst_17 : bf16 to vector<128x64xbf16>
    %25 = arith.maximumf %23, %24 : vector<128x64xbf16>
    %c0_18 = arith.constant 0 : index
    %c0_19 = arith.constant 0 : index
    %26 = vector.load %arg8[%c0_18, %c0_19] : memref<1x64xbf16, #tpu.memory_space<vmem>>, vector<1x64xbf16>
    %cst_20 = arith.constant dense<0.000000e+00> : vector<1x128xf32>
    %27 = tpu.matmul %26, %25, %cst_20 {dimension_numbers = #tpu.dot_dimension_numbers<[1], [1], [0], [0], [0, 0, 1, 0], [], []>} : vector<1x64xbf16>, vector<128x64xbf16>, vector<1x128xf32> -> vector<1x128xf32>
    %c0_21 = arith.constant 0 : index
    %c0_22 = arith.constant 0 : index
    %28 = vector.load %arg9[%c0_21, %c0_22] : memref<1x1xf32, #tpu.memory_space<vmem>>, vector<1x1xf32>
    %29 = vector.broadcast %28 : vector<1x1xf32> to vector<1x128xf32>
    %30 = arith.addf %27, %29 : vector<1x128xf32>
    %31 = vector.shape_cast %30 : vector<1x128xf32> to vector<1x1x128xf32>
    %c0_23 = arith.constant 0 : index
    %c0_24 = arith.constant 0 : index
    %c0_25 = arith.constant 0 : index
    %32 = vector.load %arg10[%c0_23, %c0_24, %c0_25] : memref<1x1x128xf32, #tpu.memory_space<vmem>>, vector<1x1x128xf32>
    tpu.vector_store %arg10[%c0_23, %c0_24, %c0_25], %31 {strides = array<i32>} : memref<1x1x128xf32, #tpu.memory_space<vmem>>, vector<1x1x128xf32>,
    return
  }
  func.func @transform_0(%arg0: i32) -> (i32, i32) {
    %c0_i32 = arith.constant 0 : i32
    %c0_i32_0 = arith.constant 0 : i32
    return %arg0, %c0_i32 : i32, i32
  }
  func.func @transform_1(%arg0: i32) -> (i32, i32) {
    %c0_i32 = arith.constant 0 : i32
    %c0_i32_0 = arith.constant 0 : i32
    %c0_i32_1 = arith.constant 0 : i32
    return %c0_i32, %c0_i32_0 : i32, i32
  }
  func.func @transform_2(%arg0: i32) -> (i32, i32) {
    %c0_i32 = arith.constant 0 : i32
    %c0_i32_0 = arith.constant 0 : i32
    %c0_i32_1 = arith.constant 0 : i32
    return %c0_i32, %c0_i32_0 : i32, i32
  }
  func.func @transform_3(%arg0: i32) -> (i32, i32) {
    %c0_i32 = arith.constant 0 : i32
    %c0_i32_0 = arith.constant 0 : i32
    %c0_i32_1 = arith.constant 0 : i32
    return %c0_i32, %c0_i32_0 : i32, i32
  }
  func.func @transform_4(%arg0: i32) -> (i32, i32) {
    %c0_i32 = arith.constant 0 : i32
    %c0_i32_0 = arith.constant 0 : i32
    %c0_i32_1 = arith.constant 0 : i32
    return %c0_i32, %c0_i32_0 : i32, i32
  }
  func.func @transform_5(%arg0: i32) -> (i32, i32) {
    %c0_i32 = arith.constant 0 : i32
    %c0_i32_0 = arith.constant 0 : i32
    %c0_i32_1 = arith.constant 0 : i32
    return %c0_i32, %c0_i32_0 : i32, i32
  }
  func.func @transform_6(%arg0: i32) -> (i32, i32) {
    %c0_i32 = arith.constant 0 : i32
    %c0_i32_0 = arith.constant 0 : i32
    %c0_i32_1 = arith.constant 0 : i32
    return %c0_i32, %c0_i32_0 : i32, i32
  }
  func.func @transform_7(%arg0: i32) -> (i32, i32) {
    %c0_i32 = arith.constant 0 : i32
    %c0_i32_0 = arith.constant 0 : i32
    %c0_i32_1 = arith.constant 0 : i32
    return %c0_i32, %c0_i32_0 : i32, i32
  }
  func.func @transform_8(%arg0: i32) -> (i32, i32) {
    %c0_i32 = arith.constant 0 : i32
    %c0_i32_0 = arith.constant 0 : i32
    %c0_i32_1 = arith.constant 0 : i32
    return %c0_i32, %c0_i32_0 : i32, i32
  }
  func.func @transform_9(%arg0: i32) -> (i32, i32, i32) {
    %c0_i32 = arith.constant 0 : i32
    %c0_i32_0 = arith.constant 0 : i32
    %c0_i32_1 = arith.constant 0 : i32
    return %arg0, %c0_i32, %c0_i32_0 : i32, i32, i32
  }
}

</mosaic_0001>

<bundles_post_ra>
// kernel: tpu_custom_call.1
= control target key start
LH: loop header
LB: loop body
LE: loop exit
PB: predicated region body
PF: predicated region fallthrough
CT: control target
= control target key end

     0   :  { %s1619_s0 = inlined_call_operand.vmem [shape: f32[8,13], index: 0, kind: input, shape index: {}]   ;;  %s1620_s1 = inlined_call_operand.vmem [shape: bf16[13,128], index: 1, kind: input, shape index: {}]   ;;  %s1621_s2 = inlined_call_operand.vmem [shape: bf16[1,128], index: 2, kind: input, shape index: {}]   ;;  %s1622_s3 = inlined_call_operand.vmem [shape: bf16[128,256], index: 3, kind: input, shape index: {}]   ;;  %s1623_s4 = inlined_call_operand.vmem [shape: bf16[1,256], index: 4, kind: input, shape index: {}]   ;;  %s1624_s5 = inlined_call_operand.vmem [shape: bf16[256,64], index: 5, kind: input, shape index: {}]   ;;  %s1625_s6 = inlined_call_operand.vmem [shape: bf16[1,64], index: 6, kind: input, shape index: {}]   ;;  %s1626_s7 = inlined_call_operand.vmem [shape: bf16[1,64], index: 7, kind: input, shape index: {}]   ;;  %s1627_s8 = inlined_call_operand.<no memory space> [shape: f32[1,1], index: 8, kind: input, shape index: {}]   ;;  %s1628_s9 = inlined_call_operand.hbm [shape: f32[1,1,128], index: 9, kind: output, shape index: {}]  }
   0x1   :  { %v14_v0 = vstv %s1627_s8 }
   0x2   :  { %15 = vst [vmem:[#allocation2] sm:$0x1] %v14_v0 }
   0x3   :  { %v1045_v1 = vld [vmem:[%s1620_s1] sm:$0xf]  ;;  %v1184_v2 = vld [vmem:[%s1620_s1] sm:$0x70]  ;;  %vm92_vm0 = vcmask 1045504   ;;  %vm93_vm1 = vcmask 1046528  }
   0x4   :  { %v1046_v3 = vor.u32 %v1184_v2, %v1045_v1  ;;  %v36_v4 = vld [vmem:[%s1619_s0] sm:$0xff]  ;;  %v1249_v5 = vmov 65535   ;;  %v37_v7 = vld [vmem:[%s1619_s0 + $0x8] sm:$0xff] }
   0x5   :  { %v94_v6 = vsel %vm92_vm0, 4294967295, %v1249_v5  ;;  %v40_v8 = vld [vmem:[%s1619_s0 + $0x20] sm:$0xff]  ;;  %v41_v9 = vld [vmem:[%s1619_s0 + $0x28] sm:$0xff] }
   0x6   :  { %v95_v10 = vsel %vm93_vm1, %v94_v6, 0 }
   0x7   :  { %v97_v11 = vand.u32 %v1046_v3, %v95_v10 }
   0x8   :  { %16 = vsyncpa [#allocation4], 0  ;;  %v52_v12 = vpack.c.bf16 %v37_v7, %v36_v4  ;;  %v54_v13 = vpack.c.bf16 %v41_v9, %v40_v8  ;;  %vm67_vm2 = vcmask 105472   ;;  %v38_v14 = vld [vmem:[%s1619_s0 + $0x10] sm:$0xff]  ;;  %v39_v15 = vld [vmem:[%s1619_s0 + $0x18] sm:$0xff]  ;;  %vm985_vm3 = vcmask 523264  }
   0x9   :  { %106 = vmatpush.bf16.msra.mxu0 %v97_v11  ;;  %1217 = vmatpush.bf16.msra.mxu2 %v97_v11  ;;  %v42_v16 = vld [vmem:[%s1619_s0 + $0x30] sm:$0xff]  ;;  %v43_v17 = vld [vmem:[%s1619_s0 + $0x38] sm:$0xff]  ;;  %v53_v18 = vpack.c.bf16 %v39_v15, %v38_v14  ;;  %v48_v20 = vld [vmem:[%s1619_s0 + $0x60] sm:$0xff]  ;;  %s1251_s24 = smov [#allocation3]   ;;  %s1034_s28 = sshll.u32 %s1628_s9, 4  ;;  %s1035_s28 = int_to_ptr.hbm [resolvable:$true] %s1034_s28 }
   0xa   :  { %1218 = vmatpush.bf16.msra.mxu3 %v97_v11  ;;  %v55_v19 = vpack.c.bf16 %v43_v17, %v42_v16  ;;  %v49_v21 = vld [vmem:[%s1619_s0 + $0x68] sm:$0xff]  ;;  %v1113_v23 = vld [vmem:[%s1622_s3 + $0x70] sm:$0xf]  ;;  %v1200_v24 = vld [vmem:[%s1622_s3 + $0x74] sm:$0xf0]  ;;  %s1032_s25 = sshll.u32 %s1251_s24, 4  ;;  %s1033_s25 = int_to_ptr.vmem [resolvable:$true] %s1032_s25 }
   0xb   :  { %v58_v22 = vpack.c.bf16 %v49_v21, %v48_v20  ;;  %v1114_v25 = vor.u32 %v1200_v24, %v1113_v23  ;;  %v1199_v26 = vld [vmem:[%s1622_s3 + $0x74] sm:$0xf]  ;;  %v1115_v27 = vld [vmem:[%s1622_s3 + $0x78] sm:$0xf0]  ;;  %v1105_v28 = vld [vmem:[%s1622_s3 + $0x60] sm:$0xf] }
   0xc   :  { %1047 = vmatmul.msk.bf16.vlgmr.msra.gmra.mxu0 %vm67_vm2, %v52_v12  ;;  %1049 = vmatmul.msk.bf16.vlgmr.msra.gmra.mxu2 %vm67_vm2, %v54_v13  ;;  %v1118_v29 = vor.u32 %v1199_v26, %v1115_v27  ;;  %v1198_v30 = vld [vmem:[%s1622_s3 + $0x64] sm:$0xf0]  ;;  %v1197_v31 = vld [vmem:[%s1622_s3 + $0x64] sm:$0xf]  ;;  %v1107_v32 = vld [vmem:[%s1622_s3 + $0x68] sm:$0xf0] }
   0xd   :  { %1053 = vmatmul.msk.bf16.vlgmr.msra.gmra.mxu3 %vm67_vm2, %v58_v22  ;;  %354 = vmatpush.bf16.msra.mxu1 %v1114_v25  ;;  %v1106_v33 = vor.u32 %v1198_v30, %v1105_v28  ;;  %v1110_v34 = vor.u32 %v1197_v31, %v1107_v32  ;;  %v1097_v35 = vld [vmem:[%s1622_s3 + $0x50] sm:$0xf]  ;;  %v1196_v36 = vld [vmem:[%s1622_s3 + $0x54] sm:$0xf0]  ;;  %v1195_v37 = vld [vmem:[%s1622_s3 + $0x54] sm:$0xf] }
   0xe   :  { %403 = vmatpush.bf16.msrb.mxu2 %v1118_v29  ;;  %v1099_v38 = vld [vmem:[%s1622_s3 + $0x58] sm:$0xf0]  ;;  %v1098_v39 = vor.u32 %v1196_v36, %v1097_v35  ;;  %v44_v40 = vld [vmem:[%s1619_s0 + $0x40] sm:$0xff]  ;;  %v45_v41 = vld [vmem:[%s1619_s0 + $0x48] sm:$0xff] }
   0xf   :  { %v1102_v42 = vor.u32 %v1195_v37, %v1099_v38  ;;  %v56_v43 = vpack.c.bf16 %v45_v41, %v44_v40  ;;  %v50_v44 = vld [vmem:[%s1619_s0 + $0x70] sm:$0xff]  ;;  %v51_v45 = vld [vmem:[%s1619_s0 + $0x78] sm:$0xff]  ;;  %v1089_v50 = vld [vmem:[%s1622_s3 + $0x40] sm:$0xf] }
  0x10   :  { %v59_v46 = vpack.c.bf16 %v51_v45, %v50_v44  ;;  %v46_v47 = vld [vmem:[%s1619_s0 + $0x50] sm:$0xff]  ;;  %v47_v48 = vld [vmem:[%s1619_s0 + $0x58] sm:$0xff]  ;;  %v1194_v51 = vld [vmem:[%s1622_s3 + $0x44] sm:$0xf0] }
  0x11   :  { %355 = vmatpush.bf16.msra.mxu1 %v1106_v33  ;;  %v57_v49 = vpack.c.bf16 %v47_v48, %v46_v47  ;;  %v1193_v52 = vld [vmem:[%s1622_s3 + $0x44] sm:$0xf]  ;;  %v1090_v53 = vor.u32 %v1194_v51, %v1089_v50  ;;  %v1091_v54 = vld [vmem:[%s1622_s3 + $0x48] sm:$0xf0]  ;;  %v1081_v56 = vld [vmem:[%s1622_s3 + $0x30] sm:$0xf] }
  0x12   :  { %404 = vmatpush.bf16.msrb.mxu2 %v1110_v34  ;;  %v1094_v55 = vor.u32 %v1193_v52, %v1091_v54  ;;  %v1192_v57 = vld [vmem:[%s1622_s3 + $0x34] sm:$0xf0]  ;;  %v1191_v59 = vld [vmem:[%s1622_s3 + $0x34] sm:$0xf]  ;;  %v1083_v60 = vld [vmem:[%s1622_s3 + $0x38] sm:$0xf0] }
  0x13   :  { %v1082_v58 = vor.u32 %v1192_v57, %v1081_v56  ;;  %v1086_v61 = vor.u32 %v1191_v59, %v1083_v60  ;;  %v1073_v62 = vld [vmem:[%s1622_s3 + $0x20] sm:$0xf]  ;;  %v1190_v63 = vld [vmem:[%s1622_s3 + $0x24] sm:$0xf0]  ;;  %v1189_v0 = vld [vmem:[%s1622_s3 + $0x24] sm:$0xf] }
  0x14   :  { %v1074_v1 = vor.u32 %v1190_v63, %v1073_v62  ;;  %v1075_v2 = vld [vmem:[%s1622_s3 + $0x28] sm:$0xf0]  ;;  %v1065_v4 = vld [vmem:[%s1622_s3 + $0x10] sm:$0xf]  ;;  %v1188_v5 = vld [vmem:[%s1622_s3 + $0x14] sm:$0xf0] }
  0x15   :  { %356 = vmatpush.bf16.msra.mxu1 %v1098_v39  ;;  %v1078_v3 = vor.u32 %v1189_v0, %v1075_v2  ;;  %v1187_v6 = vld [vmem:[%s1622_s3 + $0x14] sm:$0xf]  ;;  %v1066_v7 = vor.u32 %v1188_v5, %v1065_v4  ;;  %v1067_v8 = vld [vmem:[%s1622_s3 + $0x18] sm:$0xf0]  ;;  %v1057_v10 = vld [vmem:[%s1622_s3] sm:$0xf] }
  0x16   :  { %405 = vmatpush.bf16.msrb.mxu2 %v1102_v42  ;;  %v1070_v9 = vor.u32 %v1187_v6, %v1067_v8  ;;  %v1186_v11 = vld [vmem:[%s1622_s3 + $0x4] sm:$0xf0]  ;;  %v1185_v12 = vld [vmem:[%s1622_s3 + $0x4] sm:$0xf]  ;;  %v1059_v14 = vld [vmem:[%s1622_s3 + $0x8] sm:$0xf0] }
  0x17   :  { %v1058_v13 = vor.u32 %v1186_v11, %v1057_v10  ;;  %v1062_v15 = vor.u32 %v1185_v12, %v1059_v14  ;;  %v164_v16 = vld [vmem:[%s1621_s2] sm:$0x1] }
  0x18   :  { %v166_v17 = vpack.i.b16 %v164_v16, %v164_v16 }
  0x19   :  { %357 = vmatpush.bf16.msra.mxu1 %v1090_v53 }
  0x1a   :  { %406 = vmatpush.bf16.msrb.mxu2 %v1094_v55  ;;  %v168_v20 = vperm.slane %v166_v17, 0 }
  0x1c   :  { %1048 = vmatmul.msk.bf16.gmra.mxu0 %vm67_vm2, %v53_v18  ;;  %1050 = vmatmul.msk.bf16.gmra.mxu2 %vm67_vm2, %v55_v19  ;;  %v1466_v22 = vunpack.c.l.bf16 %v168_v20 }
  0x1d   :  { %1054 = vmatmul.msk.bf16.gmra.mxu3 %vm67_vm2, %v59_v46  ;;  %358 = vmatpush.bf16.msra.mxu1 %v1082_v58 }
  0x1e   :  { %407 = vmatpush.bf16.msrb.mxu2 %v1086_v61 }
  0x21   :  { %359 = vmatpush.bf16.msra.mxu1 %v1074_v1 }
  0x22   :  { %408 = vmatpush.bf16.msrb.mxu2 %v1078_v3 }
  0x25   :  { %360 = vmatpush.bf16.msra.mxu1 %v1066_v7 }
  0x26   :  { %409 = vmatpush.bf16.msrb.mxu2 %v1070_v9 }
  0x29   :  { %361 = vmatpush.bf16.msra.mxu1 %v1058_v13 }
  0x2a   :  { %410 = vmatpush.bf16.msrb.mxu2 %v1062_v15 }
  0x2c   :  { %1051 = vmatmul.msk.bf16.gmra.mxu2 %vm67_vm2, %v56_v43 }
  0x3c   :  { %1052 = vmatmul.msk.bf16.gmra.mxu2 %vm67_vm2, %v57_v49 }
  0x89   :  { %v108_v18 = vpop.f32.mrf.mxu0 }
  0x8a   :  { %v148_v19 = vpack.c.bf16 %v108_v18, %v108_v18 }
  0x8c   :  { %v169_v21 = vunpack.c.l.bf16 %v148_v19 }
  0x8e   :  { %v186_v26 = vadd.f32 %v1466_v22, %v169_v21 }
  0x8f   :  { %v118_v24 = vpop.f32.mrf.mxu2 }
  0x90   :  { %v234_v29 = vmax.f32 %v186_v26, 0.0  ;;  %v152_v44 = vpack.c.bf16 %v118_v24, %v118_v24  ;;  %v138_v12 = vpop.f32.mrf.mxu3 }
  0x91   :  { %v110_v23 = vpop.f32.mrf.mxu0  ;;  %v160_v24 = vpack.c.bf16 %v138_v12, %v138_v12 }
  0x92   :  { %v149_v25 = vpack.c.bf16 %v110_v23, %v110_v23  ;;  %v173_v47 = vunpack.c.l.bf16 %v152_v44 }
  0x94   :  { %v170_v27 = vunpack.c.l.bf16 %v149_v25  ;;  %v190_v50 = vadd.f32 %v1466_v22, %v173_v47 }
  0x96   :  { %v187_v28 = vadd.f32 %v1466_v22, %v170_v27  ;;  %v238_v52 = vmax.f32 %v190_v50, 0.0  ;;  %v1208_v27 = vld [vmem:[%s1624_s5 + $0x38] sm:$0xff] }
  0x97   :  { %v120_v33 = vpop.f32.mrf.mxu2  ;;  %769 = vmatpush.bf16.msrb.mxu3 %v1208_v27  ;;  %v1212_v50 = vld [vmem:[%s1624_s5 + $0x58] sm:$0xff] }
  0x98   :  { %v235_v30 = vmax.f32 %v187_v28, 0.0  ;;  %v153_v45 = vpack.c.bf16 %v120_v33, %v120_v33  ;;  %v140_v20 = vpop.f32.mrf.mxu3  ;;  %v1216_v28 = vld [vmem:[%s1624_s5 + $0x78] sm:$0xff]  ;;  %v1215_v33 = vld [vmem:[%s1624_s5 + $0x70] sm:$0xff] }
  0x99   :  { %v113_v31 = vpop.f32.mrf.mxu0  ;;  %v161_v25 = vpack.c.bf16 %v140_v20, %v140_v20  ;;  %818 = vmatpush.bf16.msrb.mxu0 %v1216_v28 }
  0x9a   :  { %v250_v32 = vpack.c.bf16 %v235_v30, %v234_v29  ;;  %v150_v34 = vpack.c.bf16 %v113_v31, %v113_v31  ;;  %v174_v48 = vunpack.c.l.bf16 %v153_v45  ;;  %v181_v30 = vunpack.c.l.bf16 %v160_v24  ;;  %v1205_v45 = vld [vmem:[%s1624_s5 + $0x20] sm:$0xff] }
  0x9b   :  { %v182_v31 = vunpack.c.l.bf16 %v161_v25 }
  0x9c   :  { %362 = vmatmul.bf16.vlgmr.msra.gmra.mxu1 %v250_v32  ;;  %411 = vmatmul.bf16.vlgmr.msrb.gmra.mxu2 %v250_v32  ;;  %v171_v35 = vunpack.c.l.bf16 %v150_v34  ;;  %v191_v51 = vadd.f32 %v1466_v22, %v174_v48  ;;  %v1207_v32 = vld [vmem:[%s1624_s5 + $0x30] sm:$0xff]  ;;  %v198_v34 = vadd.f32 %v1466_v22, %v181_v30  ;;  %v1213_v48 = vld [vmem:[%s1624_s5 + $0x60] sm:$0xff] }
  0x9d   :  { %770 = vmatpush.bf16.msrb.mxu3 %v1207_v32  ;;  %819 = vmatpush.bf16.msrb.mxu0 %v1215_v33 }
  0x9e   :  { %v188_v38 = vadd.f32 %v1466_v22, %v171_v35  ;;  %v239_v53 = vmax.f32 %v191_v51, 0.0  ;;  %v199_v35 = vadd.f32 %v1466_v22, %v182_v31 }
  0x9f   :  { %v123_v40 = vpop.f32.mrf.mxu2 }
  0xa0   :  { %v236_v42 = vmax.f32 %v188_v38, 0.0  ;;  %v154_v55 = vpack.c.bf16 %v123_v40, %v123_v40  ;;  %v252_v57 = vpack.c.bf16 %v239_v53, %v238_v52  ;;  %v143_v29 = vpop.f32.mrf.mxu3  ;;  %v247_v38 = vmax.f32 %v199_v35, 0.0  ;;  %v1206_v40 = vld [vmem:[%s1624_s5 + $0x28] sm:$0xff]  ;;  %v1203_v53 = vld [vmem:[%s1624_s5 + $0x10] sm:$0xff] }
  0xa1   :  { %v115_v36 = vpop.f32.mrf.mxu0  ;;  %771 = vmatpush.bf16.msrb.mxu3 %v1206_v40 }
  0xa2   :  { %v151_v37 = vpack.c.bf16 %v115_v36, %v115_v36  ;;  %v175_v58 = vunpack.c.l.bf16 %v154_v55  ;;  %v468_v36 = vld [vmem:[%s1623_s4] sm:$0x3] }
  0xa3   :  { %470 = vst [vmem:[#allocation1] ss:$9 sm:$0xff] %v468_v36 }
  0xa4   :  { %v172_v39 = vunpack.c.l.bf16 %v151_v37  ;;  %v192_v60 = vadd.f32 %v1466_v22, %v175_v58  ;;  %v246_v37 = vmax.f32 %v198_v34, 0.0 }
  0xa5   :  { %772 = vmatpush.bf16.msrb.mxu3 %v1205_v45 }
  0xa6   :  { %v189_v41 = vadd.f32 %v1466_v22, %v172_v39  ;;  %v240_v63 = vmax.f32 %v192_v60, 0.0  ;;  %v256_v44 = vpack.c.bf16 %v247_v38, %v246_v37  ;;  %v1209_v60 = vld [vmem:[%s1624_s5 + $0x40] sm:$0xff] }
  0xa7   :  { %v125_v49 = vpop.f32.mrf.mxu2 }
  0xa8   :  { %v237_v43 = vmax.f32 %v189_v41, 0.0  ;;  %v155_v56 = vpack.c.bf16 %v125_v49, %v125_v49  ;;  %v145_v39 = vpop.f32.mrf.mxu3  ;;  %v1214_v41 = vld [vmem:[%s1624_s5 + $0x68] sm:$0xff]  ;;  %v1204_v49 = vld [vmem:[%s1624_s5 + $0x18] sm:$0xff] }
  0xa9   :  { %820 = vmatpush.bf16.msrb.mxu0 %v1214_v41  ;;  %773 = vmatpush.bf16.msrb.mxu3 %v1204_v49 }
  0xaa   :  { %v251_v46 = vpack.c.bf16 %v237_v43, %v236_v42  ;;  %v176_v59 = vunpack.c.l.bf16 %v155_v56  ;;  %v162_v42 = vpack.c.bf16 %v143_v29, %v143_v29  ;;  %v163_v43 = vpack.c.bf16 %v145_v39, %v145_v39 }
  0xac   :  { %367 = vmatmul.bf16.gmra.mxu1 %v251_v46  ;;  %416 = vmatmul.bf16.gmra.mxu2 %v251_v46  ;;  %v193_v61 = vadd.f32 %v1466_v22, %v176_v59  ;;  %v183_v46 = vunpack.c.l.bf16 %v162_v42  ;;  %v184_v47 = vunpack.c.l.bf16 %v163_v43  ;;  %v1201_v59 = vld [vmem:[%s1624_s5] sm:$0xff] }
  0xad   :  { %821 = vmatpush.bf16.msrb.mxu0 %v1213_v48  ;;  %774 = vmatpush.bf16.msrb.mxu3 %v1203_v53 }
  0xae   :  { %v241_v0 = vmax.f32 %v193_v61, 0.0  ;;  %v200_v51 = vadd.f32 %v1466_v22, %v183_v46  ;;  %v201_v52 = vadd.f32 %v1466_v22, %v184_v47 }
  0xaf   :  { %v128_v54 = vpop.f32.mrf.mxu2 }
  0xb0   :  { %v156_v1 = vpack.c.bf16 %v128_v54, %v128_v54  ;;  %v253_v3 = vpack.c.bf16 %v241_v0, %v240_v63  ;;  %v1211_v54 = vld [vmem:[%s1624_s5 + $0x50] sm:$0xff]  ;;  %v248_v55 = vmax.f32 %v200_v51, 0.0  ;;  %v249_v56 = vmax.f32 %v201_v52, 0.0 }
  0xb1   :  { %822 = vmatpush.bf16.msrb.mxu0 %v1212_v50  ;;  %v472_v63 = vld [vmem:[#allocation1 + $0x9] sm:$0xff] }
  0xb2   :  { %v177_v5 = vunpack.c.l.bf16 %v156_v1  ;;  %v257_v58 = vpack.c.bf16 %v249_v56, %v248_v55  ;;  %v476_v1 = vpack.i.b16 %v472_v63, %v472_v63 }
  0xb4   :  { %v194_v7 = vadd.f32 %v1466_v22, %v177_v5 }
  0xb5   :  { %823 = vmatpush.bf16.msrb.mxu0 %v1211_v54 }
  0xb6   :  { %v242_v9 = vmax.f32 %v194_v7, 0.0 }
  0xb7   :  { %v130_v62 = vpop.f32.mrf.mxu2 }
  0xb8   :  { %v157_v2 = vpack.c.bf16 %v130_v62, %v130_v62  ;;  %v471_v62 = vld [vmem:[#allocation1] sm:$0xff] }
  0xb9   :  { %v473_v0 = vpack.i.b16 %v471_v62, %v471_v62 }
  0xba   :  { %v178_v6 = vunpack.c.l.bf16 %v157_v2 }
  0xbb   :  { %v475_v5 = vperm.slane %v473_v0, 0 }
  0xbc   :  { %372 = vmatmul.bf16.gmra.mxu1 %v252_v57  ;;  %421 = vmatmul.bf16.gmra.mxu2 %v252_v57  ;;  %v195_v8 = vadd.f32 %v1466_v22, %v178_v6  ;;  %v1202_v57 = vld [vmem:[%s1624_s5 + $0x8] sm:$0xff]  ;;  %v478_v6 = vperm.slane %v476_v1, 0 }
  0xbd   :  { %775 = vmatpush.bf16.msrb.mxu3 %v1202_v57 }
  0xbe   :  { %v243_v10 = vmax.f32 %v195_v8, 0.0 }
  0xbf   :  { %v133_v4 = vpop.f32.mrf.mxu2 }
  0xc0   :  { %v158_v13 = vpack.c.bf16 %v133_v4, %v133_v4  ;;  %v254_v15 = vpack.c.bf16 %v243_v10, %v242_v9  ;;  %v1535_v9 = vunpack.c.l.bf16 %v475_v5  ;;  %v1537_v10 = vunpack.c.l.bf16 %v478_v6 }
  0xc1   :  { %776 = vmatpush.bf16.msrb.mxu3 %v1201_v59 }
  0xc2   :  { %v179_v16 = vunpack.c.l.bf16 %v158_v13 }
  0xc4   :  { %v196_v18 = vadd.f32 %v1466_v22, %v179_v16 }
  0xc6   :  { %v244_v21 = vmax.f32 %v196_v18, 0.0 }
  0xc7   :  { %v135_v11 = vpop.f32.mrf.mxu2 }
  0xc8   :  { %v159_v14 = vpack.c.bf16 %v135_v11, %v135_v11 }
  0xca   :  { %v180_v17 = vunpack.c.l.bf16 %v159_v14 }
  0xcc   :  { %377 = vmatmul.bf16.gmra.mxu1 %v253_v3  ;;  %426 = vmatmul.bf16.gmra.mxu2 %v253_v3  ;;  %v197_v19 = vadd.f32 %v1466_v22, %v180_v17  ;;  %v1210_v22 = vld [vmem:[%s1624_s5 + $0x48] sm:$0xff] }
  0xcd   :  { %824 = vmatpush.bf16.msrb.mxu0 %v1210_v22 }
  0xce   :  { %v245_v23 = vmax.f32 %v197_v19, 0.0 }
  0xd0   :  { %v255_v26 = vpack.c.bf16 %v245_v23, %v244_v21 }
  0xd1   :  { %825 = vmatpush.bf16.msrb.mxu0 %v1209_v60 }
  0xdc   :  { %382 = vmatmul.bf16.gmra.mxu1 %v254_v15  ;;  %431 = vmatmul.bf16.gmra.mxu2 %v254_v15 }
  0xec   :  { %387 = vmatmul.bf16.gmra.mxu1 %v255_v26  ;;  %436 = vmatmul.bf16.gmra.mxu2 %v255_v26 }
  0xfc   :  { %392 = vmatmul.bf16.gmra.mxu1 %v256_v44  ;;  %441 = vmatmul.bf16.gmra.mxu2 %v256_v44 }
 0x10c   :  { %397 = vmatmul.bf16.gmra.mxu1 %v257_v58  ;;  %446 = vmatmul.bf16.gmra.mxu2 %v257_v58 }
 0x119   :  { %v363_v61 = vpop.f32.mrf.mxu1 }
 0x11f   :  { %v412_v2 = vpop.f32.mrf.mxu2 }
 0x120   :  { %v452_v4 = vpack.c.bf16 %v412_v2, %v363_v61 }
 0x121   :  { %v365_v3 = vpop.f32.mrf.mxu1 }
 0x122   :  { %v479_v7 = vunpack.c.l.bf16 %v452_v4  ;;  %v480_v8 = vunpack.c.h.bf16 %v452_v4 }
 0x124   :  { %v513_v14 = vadd.f32 %v1535_v9, %v479_v7  ;;  %v514_v15 = vadd.f32 %v1537_v10, %v480_v8 }
 0x126   :  { %v593_v20 = vmax.f32 %v513_v14, 0.0  ;;  %v594_v21 = vmax.f32 %v514_v15, 0.0 }
 0x127   :  { %v414_v11 = vpop.f32.mrf.mxu2 }
 0x128   :  { %v453_v12 = vpack.c.bf16 %v414_v11, %v365_v3 }
 0x129   :  { %v368_v13 = vpop.f32.mrf.mxu1 }
 0x12a   :  { %v481_v16 = vunpack.c.l.bf16 %v453_v12  ;;  %v482_v17 = vunpack.c.h.bf16 %v453_v12 }
 0x12c   :  { %v515_v18 = vadd.f32 %v1535_v9, %v481_v16  ;;  %v516_v19 = vadd.f32 %v1537_v10, %v482_v17 }
 0x12e   :  { %v595_v23 = vmax.f32 %v515_v18, 0.0  ;;  %v596_v24 = vmax.f32 %v516_v19, 0.0 }
 0x12f   :  { %v417_v25 = vpop.f32.mrf.mxu2 }
 0x130   :  { %v625_v26 = vpack.c.bf16 %v595_v23, %v593_v20  ;;  %v626_v27 = vpack.c.bf16 %v596_v24, %v594_v21  ;;  %v454_v29 = vpack.c.bf16 %v417_v25, %v368_v13 }
 0x131   :  { %v370_v28 = vpop.f32.mrf.mxu1 }
 0x132   :  { %777 = vmatmul.bf16.vlgmr.msrb.gmra.mxu3 %v625_v26  ;;  %826 = vmatmul.bf16.vlgmr.msrb.gmra.mxu0 %v626_v27  ;;  %v483_v30 = vunpack.c.l.bf16 %v454_v29  ;;  %v484_v31 = vunpack.c.h.bf16 %v454_v29 }
 0x134   :  { %v517_v37 = vadd.f32 %v1535_v9, %v483_v30  ;;  %v518_v38 = vadd.f32 %v1537_v10, %v484_v31 }
 0x136   :  { %v597_v41 = vmax.f32 %v517_v37, 0.0  ;;  %v598_v43 = vmax.f32 %v518_v38, 0.0 }
 0x137   :  { %v419_v32 = vpop.f32.mrf.mxu2 }
 0x138   :  { %v455_v33 = vpack.c.bf16 %v419_v32, %v370_v28 }
 0x139   :  { %v373_v34 = vpop.f32.mrf.mxu1 }
 0x13a   :  { %v485_v35 = vunpack.c.l.bf16 %v455_v33  ;;  %v486_v36 = vunpack.c.h.bf16 %v455_v33 }
 0x13c   :  { %v519_v39 = vadd.f32 %v1535_v9, %v485_v35  ;;  %v520_v40 = vadd.f32 %v1537_v10, %v486_v36 }
 0x13e   :  { %v599_v42 = vmax.f32 %v519_v39, 0.0  ;;  %v600_v44 = vmax.f32 %v520_v40, 0.0 }
 0x13f   :  { %v422_v45 = vpop.f32.mrf.mxu2 }
 0x140   :  { %v627_v46 = vpack.c.bf16 %v599_v42, %v597_v41  ;;  %v628_v47 = vpack.c.bf16 %v600_v44, %v598_v43  ;;  %v456_v49 = vpack.c.bf16 %v422_v45, %v373_v34 }
 0x141   :  { %v375_v48 = vpop.f32.mrf.mxu1 }
 0x142   :  { %782 = vmatmul.bf16.gmra.mxu3 %v627_v46  ;;  %831 = vmatmul.bf16.gmra.mxu0 %v628_v47  ;;  %v487_v50 = vunpack.c.l.bf16 %v456_v49  ;;  %v488_v51 = vunpack.c.h.bf16 %v456_v49 }
 0x144   :  { %v521_v57 = vadd.f32 %v1535_v9, %v487_v50  ;;  %v522_v22 = vadd.f32 %v1537_v10, %v488_v51 }
 0x146   :  { %v601_v60 = vmax.f32 %v521_v57, 0.0  ;;  %v602_v62 = vmax.f32 %v522_v22, 0.0 }
 0x147   :  { %v424_v52 = vpop.f32.mrf.mxu2 }
 0x148   :  { %v457_v53 = vpack.c.bf16 %v424_v52, %v375_v48 }
 0x149   :  { %v378_v54 = vpop.f32.mrf.mxu1 }
 0x14a   :  { %v489_v55 = vunpack.c.l.bf16 %v457_v53  ;;  %v490_v56 = vunpack.c.h.bf16 %v457_v53 }
 0x14c   :  { %v523_v58 = vadd.f32 %v1535_v9, %v489_v55  ;;  %v524_v59 = vadd.f32 %v1537_v10, %v490_v56 }
 0x14e   :  { %v603_v61 = vmax.f32 %v523_v58, 0.0  ;;  %v604_v63 = vmax.f32 %v524_v59, 0.0 }
 0x14f   :  { %v427_v0 = vpop.f32.mrf.mxu2 }
 0x150   :  { %v629_v1 = vpack.c.bf16 %v603_v61, %v601_v60  ;;  %v630_v2 = vpack.c.bf16 %v604_v63, %v602_v62  ;;  %v458_v4 = vpack.c.bf16 %v427_v0, %v378_v54 }
 0x151   :  { %v380_v3 = vpop.f32.mrf.mxu1 }
 0x152   :  { %787 = vmatmul.bf16.gmra.mxu3 %v629_v1  ;;  %836 = vmatmul.bf16.gmra.mxu0 %v630_v2  ;;  %v491_v5 = vunpack.c.l.bf16 %v458_v4  ;;  %v492_v6 = vunpack.c.h.bf16 %v458_v4 }
 0x154   :  { %v525_v14 = vadd.f32 %v1535_v9, %v491_v5  ;;  %v526_v15 = vadd.f32 %v1537_v10, %v492_v6 }
 0x156   :  { %v605_v18 = vmax.f32 %v525_v14, 0.0  ;;  %v606_v20 = vmax.f32 %v526_v15, 0.0 }
 0x157   :  { %v429_v7 = vpop.f32.mrf.mxu2 }
 0x158   :  { %v459_v8 = vpack.c.bf16 %v429_v7, %v380_v3 }
 0x159   :  { %v383_v11 = vpop.f32.mrf.mxu1 }
 0x15a   :  { %v493_v12 = vunpack.c.l.bf16 %v459_v8  ;;  %v494_v13 = vunpack.c.h.bf16 %v459_v8 }
 0x15c   :  { %v527_v16 = vadd.f32 %v1535_v9, %v493_v12  ;;  %v528_v17 = vadd.f32 %v1537_v10, %v494_v13 }
 0x15e   :  { %v607_v19 = vmax.f32 %v527_v16, 0.0  ;;  %v608_v21 = vmax.f32 %v528_v17, 0.0 }
 0x15f   :  { %v432_v23 = vpop.f32.mrf.mxu2 }
 0x160   :  { %v631_v24 = vpack.c.bf16 %v607_v19, %v605_v18  ;;  %v632_v25 = vpack.c.bf16 %v608_v21, %v606_v20  ;;  %v460_v27 = vpack.c.bf16 %v432_v23, %v383_v11 }
 0x161   :  { %v385_v26 = vpop.f32.mrf.mxu1 }
 0x162   :  { %792 = vmatmul.bf16.gmra.mxu3 %v631_v24  ;;  %841 = vmatmul.bf16.gmra.mxu0 %v632_v25  ;;  %v495_v28 = vunpack.c.l.bf16 %v460_v27  ;;  %v496_v29 = vunpack.c.h.bf16 %v460_v27 }
 0x164   :  { %v529_v35 = vadd.f32 %v1535_v9, %v495_v28  ;;  %v530_v36 = vadd.f32 %v1537_v10, %v496_v29 }
 0x166   :  { %v609_v39 = vmax.f32 %v529_v35, 0.0  ;;  %v610_v41 = vmax.f32 %v530_v36, 0.0 }
 0x167   :  { %v434_v30 = vpop.f32.mrf.mxu2 }
 0x168   :  { %v461_v31 = vpack.c.bf16 %v434_v30, %v385_v26 }
 0x169   :  { %v388_v32 = vpop.f32.mrf.mxu1 }
 0x16a   :  { %v497_v33 = vunpack.c.l.bf16 %v461_v31  ;;  %v498_v34 = vunpack.c.h.bf16 %v461_v31 }
 0x16c   :  { %v531_v37 = vadd.f32 %v1535_v9, %v497_v33  ;;  %v532_v38 = vadd.f32 %v1537_v10, %v498_v34 }
 0x16e   :  { %v611_v40 = vmax.f32 %v531_v37, 0.0  ;;  %v612_v42 = vmax.f32 %v532_v38, 0.0 }
 0x16f   :  { %v437_v43 = vpop.f32.mrf.mxu2 }
 0x170   :  { %v633_v44 = vpack.c.bf16 %v611_v40, %v609_v39  ;;  %v634_v45 = vpack.c.bf16 %v612_v42, %v610_v41  ;;  %v462_v47 = vpack.c.bf16 %v437_v43, %v388_v32  ;;  %v883_v43 = vld [vmem:[%s1625_s6] sm:$0x1] }
 0x171   :  { %v390_v46 = vpop.f32.mrf.mxu1 }
 0x172   :  { %797 = vmatmul.bf16.gmra.mxu3 %v633_v44  ;;  %846 = vmatmul.bf16.gmra.mxu0 %v634_v45  ;;  %v499_v48 = vunpack.c.l.bf16 %v462_v47  ;;  %v500_v49 = vunpack.c.h.bf16 %v462_v47 }
 0x174   :  { %v533_v55 = vadd.f32 %v1535_v9, %v499_v48  ;;  %v534_v56 = vadd.f32 %v1537_v10, %v500_v49 }
 0x176   :  { %v613_v58 = vmax.f32 %v533_v55, 0.0  ;;  %v614_v60 = vmax.f32 %v534_v56, 0.0 }
 0x177   :  { %v439_v50 = vpop.f32.mrf.mxu2 }
 0x178   :  { %v463_v51 = vpack.c.bf16 %v439_v50, %v390_v46  ;;  %v885_v46 = vpack.i.b16 %v883_v43, %v883_v43 }
 0x179   :  { %v393_v52 = vpop.f32.mrf.mxu1 }
 0x17a   :  { %v501_v53 = vunpack.c.l.bf16 %v463_v51  ;;  %v502_v54 = vunpack.c.h.bf16 %v463_v51  ;;  %v887_v48 = vperm.slane %v885_v46, 0 }
 0x17c   :  { %v535_v57 = vadd.f32 %v1535_v9, %v501_v53  ;;  %v536_v22 = vadd.f32 %v1537_v10, %v502_v54  ;;  %v1574_v50 = vunpack.c.l.bf16 %v887_v48 }
 0x17e   :  { %v615_v59 = vmax.f32 %v535_v57, 0.0  ;;  %v616_v61 = vmax.f32 %v536_v22, 0.0 }
 0x17f   :  { %v442_v62 = vpop.f32.mrf.mxu2 }
 0x180   :  { %v635_v63 = vpack.c.bf16 %v615_v59, %v613_v58  ;;  %v636_v0 = vpack.c.bf16 %v616_v61, %v614_v60  ;;  %v464_v1 = vpack.c.bf16 %v442_v62, %v393_v52 }
 0x181   :  { %v395_v2 = vpop.f32.mrf.mxu1 }
 0x182   :  { %802 = vmatmul.bf16.gmra.mxu3 %v635_v63  ;;  %851 = vmatmul.bf16.gmra.mxu0 %v636_v0  ;;  %v503_v3 = vunpack.c.l.bf16 %v464_v1  ;;  %v504_v4 = vunpack.c.h.bf16 %v464_v1 }
 0x184   :  { %v537_v11 = vadd.f32 %v1535_v9, %v503_v3  ;;  %v538_v12 = vadd.f32 %v1537_v10, %v504_v4 }
 0x186   :  { %v617_v16 = vmax.f32 %v537_v11, 0.0  ;;  %v618_v18 = vmax.f32 %v538_v12, 0.0 }
 0x187   :  { %v444_v5 = vpop.f32.mrf.mxu2 }
 0x188   :  { %v465_v6 = vpack.c.bf16 %v444_v5, %v395_v2 }
 0x189   :  { %v398_v15 = vpop.f32.mrf.mxu1 }
 0x18a   :  { %v505_v7 = vunpack.c.l.bf16 %v465_v6  ;;  %v506_v8 = vunpack.c.h.bf16 %v465_v6 }
 0x18c   :  { %v539_v13 = vadd.f32 %v1535_v9, %v505_v7  ;;  %v540_v14 = vadd.f32 %v1537_v10, %v506_v8 }
 0x18e   :  { %v619_v17 = vmax.f32 %v539_v13, 0.0  ;;  %v620_v19 = vmax.f32 %v540_v14, 0.0 }
 0x18f   :  { %v447_v20 = vpop.f32.mrf.mxu2 }
 0x190   :  { %v637_v21 = vpack.c.bf16 %v619_v17, %v617_v16  ;;  %v638_v23 = vpack.c.bf16 %v620_v19, %v618_v18  ;;  %v466_v24 = vpack.c.bf16 %v447_v20, %v398_v15 }
 0x191   :  { %v400_v27 = vpop.f32.mrf.mxu1 }
 0x192   :  { %807 = vmatmul.bf16.gmra.mxu3 %v637_v21  ;;  %856 = vmatmul.bf16.gmra.mxu0 %v638_v23  ;;  %v507_v25 = vunpack.c.l.bf16 %v466_v24  ;;  %v508_v26 = vunpack.c.h.bf16 %v466_v24 }
 0x194   :  { %v541_v32 = vadd.f32 %v1535_v9, %v507_v25  ;;  %v542_v33 = vadd.f32 %v1537_v10, %v508_v26 }
 0x196   :  { %v621_v36 = vmax.f32 %v541_v32, 0.0  ;;  %v622_v38 = vmax.f32 %v542_v33, 0.0 }
 0x197   :  { %v449_v28 = vpop.f32.mrf.mxu2 }
 0x198   :  { %v467_v29 = vpack.c.bf16 %v449_v28, %v400_v27 }
 0x19a   :  { %v509_v30 = vunpack.c.l.bf16 %v467_v29  ;;  %v510_v31 = vunpack.c.h.bf16 %v467_v29 }
 0x19c   :  { %v543_v34 = vadd.f32 %v1535_v9, %v509_v30  ;;  %v544_v35 = vadd.f32 %v1537_v10, %v510_v31 }
 0x19e   :  { %v623_v37 = vmax.f32 %v543_v34, 0.0  ;;  %v624_v39 = vmax.f32 %v544_v35, 0.0 }
 0x1a0   :  { %v639_v40 = vpack.c.bf16 %v623_v37, %v621_v36  ;;  %v640_v41 = vpack.c.bf16 %v624_v39, %v622_v38 }
 0x1a2   :  { %812 = vmatmul.bf16.gmra.mxu3 %v639_v40  ;;  %861 = vmatmul.bf16.gmra.mxu0 %v640_v41 }
 0x1af   :  { %v827_v42 = vpop.f32.mrf.mxu0 }
 0x1b5   :  { %v778_v44 = vpop.f32.mrf.mxu3 }
 0x1b6   :  { %v828_v45 = vadd.f32 %v827_v42, %v778_v44 }
 0x1b7   :  { %v829_v47 = vpop.f32.mrf.mxu0 }
 0x1b8   :  { %v867_v9 = vpack.c.bf16 %v828_v45, %v828_v45 }
 0x1ba   :  { %v888_v49 = vunpack.c.l.bf16 %v867_v9 }
 0x1bc   :  { %v905_v54 = vadd.f32 %v1574_v50, %v888_v49 }
 0x1bd   :  { %v780_v10 = vpop.f32.mrf.mxu3 }
 0x1be   :  { %v830_v51 = vadd.f32 %v829_v47, %v780_v10  ;;  %v953_v22 = vmax.f32 %v905_v54, 0.0 }
 0x1bf   :  { %v832_v52 = vpop.f32.mrf.mxu0 }
 0x1c0   :  { %v868_v53 = vpack.c.bf16 %v830_v51, %v830_v51 }
 0x1c2   :  { %v889_v55 = vunpack.c.l.bf16 %v868_v53 }
 0x1c4   :  { %v906_v56 = vadd.f32 %v1574_v50, %v889_v55 }
 0x1c5   :  { %v783_v57 = vpop.f32.mrf.mxu3 }
 0x1c6   :  { %v954_v58 = vmax.f32 %v906_v56, 0.0  ;;  %v833_v59 = vadd.f32 %v832_v52, %v783_v57 }
 0x1c7   :  { %v834_v60 = vpop.f32.mrf.mxu0 }
 0x1c8   :  { %v1578_v61 = vpack.c.bf16 %v954_v58, %v953_v22  ;;  %v869_v62 = vpack.c.bf16 %v833_v59, %v833_v59 }
 0x1ca   :  { %v890_v0 = vunpack.c.l.bf16 %v869_v62 }
 0x1cc   :  { %v907_v4 = vadd.f32 %v1574_v50, %v890_v0 }
 0x1cd   :  { %v785_v63 = vpop.f32.mrf.mxu3 }
 0x1ce   :  { %v835_v1 = vadd.f32 %v834_v60, %v785_v63  ;;  %v955_v8 = vmax.f32 %v907_v4, 0.0 }
 0x1cf   :  { %v837_v2 = vpop.f32.mrf.mxu0 }
 0x1d0   :  { %v870_v3 = vpack.c.bf16 %v835_v1, %v835_v1 }
 0x1d2   :  { %v891_v5 = vunpack.c.l.bf16 %v870_v3 }
 0x1d4   :  { %v908_v6 = vadd.f32 %v1574_v50, %v891_v5 }
 0x1d5   :  { %v788_v7 = vpop.f32.mrf.mxu3 }
 0x1d6   :  { %v956_v11 = vmax.f32 %v908_v6, 0.0  ;;  %v838_v12 = vadd.f32 %v837_v2, %v788_v7 }
 0x1d7   :  { %v839_v13 = vpop.f32.mrf.mxu0 }
 0x1d8   :  { %v1582_v14 = vpack.c.bf16 %v956_v11, %v955_v8  ;;  %v871_v15 = vpack.c.bf16 %v838_v12, %v838_v12 }
 0x1da   :  { %v892_v17 = vunpack.c.l.bf16 %v871_v15 }
 0x1dc   :  { %v909_v21 = vadd.f32 %v1574_v50, %v892_v17 }
 0x1dd   :  { %v790_v16 = vpop.f32.mrf.mxu3 }
 0x1de   :  { %v840_v18 = vadd.f32 %v839_v13, %v790_v16  ;;  %v957_v26 = vmax.f32 %v909_v21, 0.0 }
 0x1df   :  { %v842_v19 = vpop.f32.mrf.mxu0 }
 0x1e0   :  { %v872_v20 = vpack.c.bf16 %v840_v18, %v840_v18 }
 0x1e2   :  { %v893_v23 = vunpack.c.l.bf16 %v872_v20 }
 0x1e4   :  { %v910_v24 = vadd.f32 %v1574_v50, %v893_v23 }
 0x1e5   :  { %v793_v25 = vpop.f32.mrf.mxu3 }
 0x1e6   :  { %v958_v27 = vmax.f32 %v910_v24, 0.0  ;;  %v843_v28 = vadd.f32 %v842_v19, %v793_v25 }
 0x1e7   :  { %v844_v29 = vpop.f32.mrf.mxu0 }
 0x1e8   :  { %v1586_v30 = vpack.c.bf16 %v958_v27, %v957_v26  ;;  %v873_v31 = vpack.c.bf16 %v843_v28, %v843_v28 }
 0x1ea   :  { %v894_v33 = vunpack.c.l.bf16 %v873_v31 }
 0x1ec   :  { %v911_v37 = vadd.f32 %v1574_v50, %v894_v33 }
 0x1ed   :  { %v795_v32 = vpop.f32.mrf.mxu3 }
 0x1ee   :  { %v845_v34 = vadd.f32 %v844_v29, %v795_v32  ;;  %v959_v41 = vmax.f32 %v911_v37, 0.0 }
 0x1ef   :  { %v847_v35 = vpop.f32.mrf.mxu0 }
 0x1f0   :  { %v874_v36 = vpack.c.bf16 %v845_v34, %v845_v34 }
 0x1f2   :  { %v895_v38 = vunpack.c.l.bf16 %v874_v36 }
 0x1f4   :  { %v912_v39 = vadd.f32 %v1574_v50, %v895_v38 }
 0x1f5   :  { %v798_v40 = vpop.f32.mrf.mxu3 }
 0x1f6   :  { %v960_v42 = vmax.f32 %v912_v39, 0.0  ;;  %v848_v43 = vadd.f32 %v847_v35, %v798_v40 }
 0x1f7   :  { %v849_v44 = vpop.f32.mrf.mxu0 }
 0x1f8   :  { %v1590_v45 = vpack.c.bf16 %v960_v42, %v959_v41  ;;  %v875_v46 = vpack.c.bf16 %v848_v43, %v848_v43 }
 0x1fa   :  { %v896_v9 = vunpack.c.l.bf16 %v875_v46 }
 0x1fc   :  { %v913_v51 = vadd.f32 %v1574_v50, %v896_v9  ;;  %v978_v9 = vld [vmem:[#allocation2] sm:$0x1] }
 0x1fd   :  { %v800_v47 = vpop.f32.mrf.mxu3 }
 0x1fe   :  { %v850_v48 = vadd.f32 %v849_v44, %v800_v47  ;;  %v961_v55 = vmax.f32 %v913_v51, 0.0  ;;  %v999_v47 = vsel %vm985_vm3, %v1590_v45, 0  ;;  %v977_v45 = vld [vmem:[%s1626_s7] sm:$0x1] }
 0x1ff   :  { %v852_v10 = vpop.f32.mrf.mxu0 }
 0x200   :  { %v876_v49 = vpack.c.bf16 %v850_v48, %v850_v48  ;;  %v1250_v48 = vmov 0  }
 0x201   :  { %1222 = vset.pattern.permute.xlu0 %v1250_v48 }
 0x202   :  { %v897_v52 = vunpack.c.l.bf16 %v876_v49  ;;  %981 = vperm.xlu0 %1222, %v978_v9   ;;  %v990_v49 = vsel %vm985_vm3, %v1578_v61, 0 }
 0x204   :  { %v914_v53 = vadd.f32 %v1574_v50, %v897_v52 }
 0x205   :  { %v803_v54 = vpop.f32.mrf.mxu3 }
 0x206   :  { %v962_v56 = vmax.f32 %v914_v53, 0.0  ;;  %v853_v20 = vadd.f32 %v852_v10, %v803_v54  ;;  %v993_v10 = vsel %vm985_vm3, %v1582_v14, 0 }
 0x207   :  { %v854_v57 = vpop.f32.mrf.mxu0 }
 0x208   :  { %v973_v22 = vpack.c.bf16 %v962_v56, %v961_v55  ;;  %v877_v28 = vpack.c.bf16 %v853_v20, %v853_v20 }
 0x20a   :  { %v898_v35 = vunpack.c.l.bf16 %v877_v28  ;;  %v1002_v46 = vsel %vm985_vm3, %v973_v22, 0 }
 0x20c   :  { %v915_v39 = vadd.f32 %v1574_v50, %v898_v35 }
 0x20d   :  { %v805_v58 = vpop.f32.mrf.mxu3 }
 0x20e   :  { %v855_v16 = vadd.f32 %v854_v57, %v805_v58  ;;  %v963_v42 = vmax.f32 %v915_v39, 0.0 }
 0x20f   :  { %v857_v59 = vpop.f32.mrf.mxu0 }
 0x210   :  { %v878_v24 = vpack.c.bf16 %v855_v16, %v855_v16 }
 0x212   :  { %v899_v32 = vunpack.c.l.bf16 %v878_v24 }
 0x214   :  { %v916_v37 = vadd.f32 %v1574_v50, %v899_v32 }
 0x215   :  { %v808_v60 = vpop.f32.mrf.mxu3 }
 0x216   :  { %v858_v5 = vadd.f32 %v857_v59, %v808_v60  ;;  %v964_v40 = vmax.f32 %v916_v37, 0.0 }
 0x217   :  { %v859_v62 = vpop.f32.mrf.mxu0 }
 0x218   :  { %v879_v13 = vpack.c.bf16 %v858_v5, %v858_v5  ;;  %v974_v43 = vpack.c.bf16 %v964_v40, %v963_v42 }
 0x21a   :  { %v900_v21 = vunpack.c.l.bf16 %v879_v13  ;;  %v1005_v44 = vsel %vm985_vm3, %v974_v43, 0 }
 0x21c   :  { %v917_v29 = vadd.f32 %v1574_v50, %v900_v21 }
 0x21d   :  { %v810_v63 = vpop.f32.mrf.mxu3 }
 0x21e   :  { %v860_v3 = vadd.f32 %v859_v62, %v810_v63  ;;  %v965_v36 = vmax.f32 %v917_v29, 0.0 }
 0x21f   :  { %v862_v0 = vpop.f32.mrf.mxu0 }
 0x220   :  { %v880_v8 = vpack.c.bf16 %v860_v3, %v860_v3 }
 0x222   :  { %v901_v17 = vunpack.c.l.bf16 %v880_v8 }
 0x224   :  { %v918_v25 = vadd.f32 %v1574_v50, %v901_v17 }
 0x225   :  { %v813_v1 = vpop.f32.mrf.mxu3 }
 0x226   :  { %v863_v2 = vadd.f32 %v862_v0, %v813_v1  ;;  %v966_v33 = vmax.f32 %v918_v25, 0.0 }
 0x227   :  { %v864_v6 = vpop.f32.mrf.mxu0 }
 0x228   :  { %v881_v4 = vpack.c.bf16 %v863_v2, %v863_v2  ;;  %v975_v38 = vpack.c.bf16 %v966_v33, %v965_v36 }
 0x22a   :  { %v902_v11 = vunpack.c.l.bf16 %v881_v4  ;;  %v1008_v41 = vsel %vm985_vm3, %v975_v38, 0 }
 0x22c   :  { %v919_v18 = vadd.f32 %v1574_v50, %v902_v11 }
 0x22d   :  { %v815_v7 = vpop.f32.mrf.mxu3 }
 0x22e   :  { %v865_v12 = vadd.f32 %v864_v6, %v815_v7  ;;  %v967_v26 = vmax.f32 %v919_v18, 0.0 }
 0x230   :  { %v882_v15 = vpack.c.bf16 %v865_v12, %v865_v12 }
 0x232   :  { %v903_v19 = vunpack.c.l.bf16 %v882_v15 }
 0x234   :  { %v920_v23 = vadd.f32 %v1574_v50, %v903_v19  ;;  %v996_v50 = vsel %vm985_vm3, %v1586_v30, 0 }
 0x236   :  { %v968_v27 = vmax.f32 %v920_v23, 0.0 }
 0x238   :  { %v976_v31 = vpack.c.bf16 %v968_v27, %v967_v26 }
 0x23a   :  { %v1011_v34 = vsel %vm985_vm3, %v976_v31, 0 }
 0x23b   :  { %1013 = vmatpush.bf16.xpose.msrb.mxu1 %v1011_v34 }
 0x243   :  { %1014 = vmatpush.bf16.xpose.msrb.mxu1 %v1008_v41 }
 0x24b   :  { %1015 = vmatpush.bf16.xpose.msrb.mxu1 %v1005_v44 }
 0x253   :  { %1016 = vmatpush.bf16.xpose.msrb.mxu1 %v1002_v46 }
 0x25b   :  { %1017 = vmatpush.bf16.xpose.msrb.mxu1 %v999_v47 }
 0x263   :  { %1018 = vmatpush.bf16.xpose.msrb.mxu1 %v996_v50 }
 0x26b   :  { %1019 = vmatpush.bf16.xpose.msrb.mxu1 %v993_v10 }
 0x273   :  { %1020 = vmatpush.bf16.xpose.msrb.mxu1 %v990_v49 }
 0x274   :  { %v982_v51 = vpop.permute.xlu0 %981 }
 0x275   :  { %v984_v52 = vperm.slane %v982_v51, 0 }
 0x27a   :  { %1183 = vmatmul.msk.bf16.vlgmr.msrb.gmra.mxu1 %vm985_vm3, %v977_v45 }
 0x2f7   :  { %v1022_v14 = vpop.f32.mrf.mxu1 }
 0x2f8   :  { %v1023_v30 = vadd.f32 %v1022_v14, %v984_v52 }
 0x2fa   :  { %1026 = vst [vmem:[#allocation3] sm:$0x1] %v1023_v30 }
 0x2fb   :  { %1037 = dma.vmem_to_hbm [thread:$0]  %s1033_s25, 16, %s1035_s28, [#allocation4]  }
 0x2ff   :  { %v1024_v61 = vpop.f32.mrf.mxu1 }
 0x300   :  { %1247 = dma.done.wait [#allocation4], 16  }
 0x301   :  { %1248 = vsyncadd [#allocation4], 4294967280 }
 0x302   :  { %1042 = vsyncpa [#allocation4], 1 }

</bundles_post_ra>
